<compile_context>
chip_gen: v6e
topology: v6e:2x2x1
jax: 0.10.0
libtpu: 0.0.40
codegen_flags: <defaults>
</compile_context>

<pallas_src>
import functools

import jax
import jax.numpy as jnp
from jax.experimental import pallas as pl
from jax.experimental.pallas import tpu as pltpu


# ----------------------------------------------------------------------------
# Pallas kernel
# ----------------------------------------------------------------------------
def _lora_linear_kernel(x_ref, wt_ref, b_ref, at_ref, bt_ref, o_ref):
    """One (tm, tn) output tile of  y = x @ W^T + b + (x @ A^T) @ (scale*B)^T."""
    x = x_ref[...]
    base = jnp.dot(x, wt_ref[...], preferred_element_type=jnp.float32) + b_ref[...]
    mid = jnp.dot(x, at_ref[...], preferred_element_type=jnp.float32)      # (tm, R)
    lora = jnp.dot(mid, bt_ref[...], preferred_element_type=jnp.float32)   # (tm, tn)
    o_ref[...] = (base + lora).astype(o_ref.dtype)


def _pick_tm(M):
    """Token tile: single block when small, else the largest clean divisor."""
    if M <= 256:
        return M
    for t in (256, 128, 64, 32, 16, 8):
        if M % t == 0:
            return t
    return M  # ragged: handled by padding in the wrapper


def _pick_tn(D_out):
    """Tile D_out only when the resident weight block would crowd VMEM."""
    if D_out <= 1024:
        return D_out
    for t in (512, 256, 128):
        if D_out % t == 0:
            return t
    return D_out


def lora_linear_2d(x2d, wt, b, at, bt_scaled):
    """x2d:(M,D_in) wt:(D_in,D_out) b:(D_out,) at:(D_in,R) bt_scaled:(R,D_out).

    Computes  x @ wt + b + (x @ at) @ bt_scaled  (LoRA scaling pre-folded into
    bt_scaled on the host).
    """
    M, D_in = x2d.shape
    D_out = wt.shape[1]
    R = at.shape[1]

    tm = _pick_tm(M)
    tn = _pick_tn(D_out)

    # Pad the token axis so the grid tiles cleanly (sliced off afterwards).
    Mp = ((M + tm - 1) // tm) * tm
    if Mp != M:
        x2d = jnp.pad(x2d, ((0, Mp - M), (0, 0)))

    b2 = b.reshape(1, D_out)

    out = pl.pallas_call(
        _lora_linear_kernel,
        out_shape=jax.ShapeDtypeStruct((Mp, D_out), x2d.dtype),
        grid_spec=pltpu.PrefetchScalarGridSpec(
            num_scalar_prefetch=0,
            grid=(Mp // tm, D_out // tn),
            in_specs=[
                pl.BlockSpec((tm, D_in), lambda i, j: (i, 0)),   # x tile
                pl.BlockSpec((D_in, tn), lambda i, j: (0, j)),   # W^T tile
                pl.BlockSpec((1, tn), lambda i, j: (0, j)),      # bias tile
                pl.BlockSpec((D_in, R), lambda i, j: (0, 0)),    # A^T (resident)
                pl.BlockSpec((R, tn), lambda i, j: (0, j)),      # scaled B^T tile
            ],
            out_specs=pl.BlockSpec((tm, tn), lambda i, j: (i, j)),
        ),
        compiler_params=pltpu.CompilerParams(
            dimension_semantics=("parallel", "parallel")),
    )(x2d, wt, b2, at, bt_scaled)
    return out[:M]


def lora_layer_forward(x, W, b, A, Bm, scaling):
    """lora_layer.forward with original_module = nn.Linear(W, b).

    x: (..., D_in); W: (D_out, D_in); b: (D_out,); A: (R, D_in); Bm: (D_out, R).
    Returns  x @ W^T + b + (x @ A^T @ B^T) * scaling.
    """
    lead = x.shape[:-1]
    D_in = x.shape[-1]
    x2d = x.reshape(-1, D_in)
    # Fold the LoRA scaling into B^T (tiny host-side op).
    bt_scaled = (Bm.T * scaling).astype(x.dtype)
    y2d = lora_linear_2d(x2d, W.T.astype(x.dtype), b.astype(x.dtype),
                         A.T.astype(x.dtype), bt_scaled)
    return y2d.reshape(*lead, W.shape[0])


# pure-JAX reference (highest matmul precision so it matches the f32 kernel)
def lora_layer_ref(x, W, b, A, Bm, scaling):
    hp = functools.partial(jnp.matmul, precision=jax.lax.Precision.HIGHEST)
    return hp(x, W.T) + b + hp(hp(x, A.T), Bm.T) * scaling


# ----------------------------------------------------------------------------
# main
# ----------------------------------------------------------------------------
if __name__ == "__main__":
    key = jax.random.PRNGKey(0)
    ks = jax.random.split(key, 10)

    # ---- small shapes consistent with the module ----
    Bsz, Seq = 2, 8
    D_in = D_out = 32
    rank, alpha = 4, 32                     # lora_layer(r=4, lora_alpha=32) -> scaling = 8.0
    scaling = alpha / rank

    x = jax.random.normal(ks[0], (Bsz, Seq, D_in), jnp.float32)
    W = jax.random.normal(ks[1], (D_out, D_in), jnp.float32) * 0.05
    b = jax.random.normal(ks[2], (D_out,), jnp.float32) * 0.01
    # lora_A: kaiming-uniform-like init; lora_B nonzero here so the LoRA branch
    # of the kernel is actually exercised (reset_parameters() would zero it,
    # the formula is identical either way).
    A = jax.random.uniform(ks[3], (rank, D_in), jnp.float32, minval=-0.3, maxval=0.3)
    Bm = jax.random.normal(ks[4], (D_out, rank), jnp.float32) * 0.02

    fwd = jax.jit(lora_layer_forward)
    out = fwd(x, W, b, A, Bm, scaling)
    jax.block_until_ready(out)

    ref = lora_layer_ref(x, W, b, A, Bm, scaling)
    assert out.shape == (Bsz, Seq, D_out)
    assert jnp.allclose(out, ref, atol=1e-3, rtol=1e-3), "small-shape mismatch vs reference"

    # ---- second check: multi-tile grid path (token tiling exercised) ----
    M2, Di2, Do2, r2 = 512, 256, 384, 8
    x2 = jax.random.normal(ks[5], (M2, Di2), jnp.float32)
    W2 = jax.random.normal(ks[6], (Do2, Di2), jnp.float32) * 0.02
    b2 = jax.random.normal(ks[7], (Do2,), jnp.float32) * 0.01
    A2 = jax.random.uniform(ks[8], (r2, Di2), jnp.float32, minval=-0.1, maxval=0.1)
    B2 = jax.random.normal(ks[9], (Do2, r2), jnp.float32) * 0.02

    out2 = fwd(x2, W2, b2, A2, B2, scaling)
    jax.block_until_ready(out2)
    ref2 = lora_layer_ref(x2, W2, b2, A2, B2, scaling)
    assert out2.shape == (M2, Do2)
    assert jnp.allclose(out2, ref2, atol=2e-3, rtol=2e-3), "tiled-shape mismatch vs reference"

    print("KERNEL_OK")
</pallas_src>

<mosaic_0001>
module attributes {stable_mosaic.version = 11 : i64} {
  func.func @_lora_linear_kernel(%arg0: i32, %arg1: i32, %arg2: memref<16x32xf32, #tpu.memory_space<vmem>>, %arg3: memref<32x32xf32, #tpu.memory_space<vmem>>, %arg4: memref<1x32xf32, #tpu.memory_space<vmem>>, %arg5: memref<32x4xf32, #tpu.memory_space<vmem>>, %arg6: memref<4x32xf32, #tpu.memory_space<vmem>>, %arg7: memref<16x32xf32, #tpu.memory_space<vmem>>) attributes {dimension_semantics = [#tpu.dimension_semantics<parallel>, #tpu.dimension_semantics<parallel>], iteration_bounds = array<i64: 1, 1>, scalar_prefetch = 0 : i64, scratch_operands = 0 : i64, tpu.core_type = #tpu.core_type<tc>, window_params = [{transform_indices = @transform_0, window_bounds = array<i64: 16, 32>}, {transform_indices = @transform_1, window_bounds = array<i64: 32, 32>}, {transform_indices = @transform_2, window_bounds = array<i64: 1, 32>}, {pipeline_mode = #tpu.pipeline_mode<synchronous>, transform_indices = @transform_3, window_bounds = array<i64: 32, 4>}, {transform_indices = @transform_4, window_bounds = array<i64: 4, 32>}, {transform_indices = @transform_5, window_bounds = array<i64: 16, 32>}]} {
    %c0 = arith.constant 0 : index
    %c0_0 = arith.constant 0 : index
    %0 = vector.load %arg2[%c0, %c0_0] : memref<16x32xf32, #tpu.memory_space<vmem>>, vector<16x32xf32>
    %c0_1 = arith.constant 0 : index
    %c0_2 = arith.constant 0 : index
    %1 = vector.load %arg3[%c0_1, %c0_2] : memref<32x32xf32, #tpu.memory_space<vmem>>, vector<32x32xf32>
    %cst = arith.constant dense<0.000000e+00> : vector<16x32xf32>
    %2 = tpu.matmul %0, %1, %cst {dimension_numbers = #tpu.dot_dimension_numbers<[1], [0], [0], [1], [0, 0, 1, 1], [], []>} : vector<16x32xf32>, vector<32x32xf32>, vector<16x32xf32> -> vector<16x32xf32>
    %c0_3 = arith.constant 0 : index
    %c0_4 = arith.constant 0 : index
    %3 = vector.load %arg4[%c0_3, %c0_4] : memref<1x32xf32, #tpu.memory_space<vmem>>, vector<1x32xf32>
    %4 = vector.broadcast %3 : vector<1x32xf32> to vector<16x32xf32>
    %5 = arith.addf %2, %4 : vector<16x32xf32>
    %c0_5 = arith.constant 0 : index
    %c0_6 = arith.constant 0 : index
    %6 = vector.load %arg5[%c0_5, %c0_6] : memref<32x4xf32, #tpu.memory_space<vmem>>, vector<32x4xf32>
    %cst_7 = arith.constant dense<0.000000e+00> : vector<16x4xf32>
    %7 = tpu.matmul %0, %6, %cst_7 {dimension_numbers = #tpu.dot_dimension_numbers<[1], [0], [0], [1], [0, 0, 1, 1], [], []>} : vector<16x32xf32>, vector<32x4xf32>, vector<16x4xf32> -> vector<16x4xf32>
    %c0_8 = arith.constant 0 : index
    %c0_9 = arith.constant 0 : index
    %8 = vector.load %arg6[%c0_8, %c0_9] : memref<4x32xf32, #tpu.memory_space<vmem>>, vector<4x32xf32>
    %cst_10 = arith.constant dense<0.000000e+00> : vector<16x32xf32>
    %9 = tpu.matmul %7, %8, %cst_10 {dimension_numbers = #tpu.dot_dimension_numbers<[1], [0], [0], [1], [0, 0, 1, 1], [], []>} : vector<16x4xf32>, vector<4x32xf32>, vector<16x32xf32> -> vector<16x32xf32>
    %10 = arith.addf %5, %9 : vector<16x32xf32>
    %c0_11 = arith.constant 0 : index
    %c0_12 = arith.constant 0 : index
    %11 = vector.load %arg7[%c0_11, %c0_12] : memref<16x32xf32, #tpu.memory_space<vmem>>, vector<16x32xf32>
    tpu.vector_store %arg7[%c0_11, %c0_12], %10 {strides = array<i32>} : memref<16x32xf32, #tpu.memory_space<vmem>>, vector<16x32xf32>,
    return
  }
  func.func @transform_0(%arg0: i32, %arg1: i32) -> (i32, i32) {
    %c0_i32 = arith.constant 0 : i32
    %c0_i32_0 = arith.constant 0 : i32
    return %arg0, %c0_i32 : i32, i32
  }
  func.func @transform_1(%arg0: i32, %arg1: i32) -> (i32, i32) {
    %c0_i32 = arith.constant 0 : i32
    %c0_i32_0 = arith.constant 0 : i32
    return %c0_i32, %arg1 : i32, i32
  }
  func.func @transform_2(%arg0: i32, %arg1: i32) -> (i32, i32) {
    %c0_i32 = arith.constant 0 : i32
    %c0_i32_0 = arith.constant 0 : i32
    return %c0_i32, %arg1 : i32, i32
  }
  func.func @transform_3(%arg0: i32, %arg1: i32) -> (i32, i32) {
    %c0_i32 = arith.constant 0 : i32
    %c0_i32_0 = arith.constant 0 : i32
    %c0_i32_1 = arith.constant 0 : i32
    return %c0_i32, %c0_i32_0 : i32, i32
  }
  func.func @transform_4(%arg0: i32, %arg1: i32) -> (i32, i32) {
    %c0_i32 = arith.constant 0 : i32
    %c0_i32_0 = arith.constant 0 : i32
    return %c0_i32, %arg1 : i32, i32
  }
  func.func @transform_5(%arg0: i32, %arg1: i32) -> (i32, i32) {
    %c0_i32 = arith.constant 0 : i32
    return %arg0, %arg1 : i32, i32
  }
}

</mosaic_0001>

<bundles_post_ra>
// kernel: lora_layer_forward.1
= control target key start
LH: loop header
LB: loop body
LE: loop exit
PB: predicated region body
PF: predicated region fallthrough
CT: control target
= control target key end

     0   :  { %vm34_vm0 = vcmask 261120   ;;  %s455_s0 = inlined_call_operand.vmem [shape: f32[16,32], index: 0, kind: input, shape index: {}]   ;;  %s456_s1 = inlined_call_operand.vmem [shape: f32[32,32], index: 1, kind: input, shape index: {}]   ;;  %s457_s2 = inlined_call_operand.vmem [shape: f32[1,32], index: 2, kind: input, shape index: {}]   ;;  %s458_s3 = inlined_call_operand.vmem [shape: f32[32,4], index: 3, kind: input, shape index: {}]   ;;  %s459_s4 = inlined_call_operand.vmem [shape: f32[4,32], index: 4, kind: input, shape index: {}]   ;;  %s460_s5 = inlined_call_operand.hbm [shape: f32[16,32], index: 5, kind: output, shape index: {}]  }
   0x1   :  { %v119_v0 = vld [vmem:[%s458_s3 + $0x18] sm:$0xff]  ;;  %v118_v1 = vld [vmem:[%s458_s3 + $0x10] sm:$0xff]  ;;  %v21_v2 = vld [vmem:[%s455_s0] sm:$0xff] }
   0x2   :  { %336 = vmatprep.subr.mxu1 %v119_v0  ;;  %v117_v3 = vld [vmem:[%s458_s3 + $0x8] sm:$0xff]  ;;  %344 = vmatprep.mubr.msk.f32.mxu1 %vm34_vm0, %v21_v2  ;;  %v26_v4 = vld [vmem:[%s456_s1 + $0x18] sm:$0xff]  ;;  %v25_v5 = vld [vmem:[%s456_s1 + $0x10] sm:$0xff] }
   0x3   :  { %337 = vmatpush3.msra.mxu1 %v119_v0  ;;  %325 = vmatprep.subr.mxu0 %v26_v4 }
   0x4   :  { %338 = vmatprep.subr.mxu1 %v118_v1 }
   0x5   :  { %10 = vsyncpa [#allocation3], 0  ;;  %339 = vmatpush3.msra.mxu1 %v118_v1  ;;  %v116_v6 = vld [vmem:[%s458_s3] sm:$0xff]  ;;  %326 = vmatpush3.msra.mxu0 %v26_v4  ;;  %v24_v7 = vld [vmem:[%s456_s1 + $0x8] sm:$0xff]  ;;  %vm203_vm1 = vcmask 1043456   ;;  %vm196_vm2 = vcmask 31744  }
   0x6   :  { %340 = vmatprep.subr.mxu1 %v117_v3  ;;  %327 = vmatprep.subr.mxu0 %v25_v5  ;;  %v22_v8 = vld [vmem:[%s455_s0 + $0x8] sm:$0xff]  ;;  %v23_v9 = vld [vmem:[%s456_s1] sm:$0xff] }
   0x7   :  { %341 = vmatpush3.msra.mxu1 %v117_v3  ;;  %328 = vmatpush3.msra.mxu0 %v25_v5  ;;  %v195_v10 = vld [vmem:[%s459_s4] sm:$0xf]  ;;  %s377_s4 = smov [#allocation2]  }
   0x8   :  { %342 = vmatprep.subr.mxu1 %v116_v6  ;;  %329 = vmatprep.subr.mxu0 %v24_v7  ;;  %v302_v14 = vld [vmem:[%s457_s2] ss:$0 sm:$0xff]  ;;  %s291_s14 = sshll.u32 %s377_s4, 4  ;;  %s292_s14 = int_to_ptr.vmem [resolvable:$true] %s291_s14 }
   0x9   :  { %343 = vmatpush3.msra.mxu1 %v116_v6  ;;  %330 = vmatpush3.msra.mxu0 %v24_v7  ;;  %s355_s15 = scalar_lea.vmem %s292_s14, 256  ;;  %p360_p1 = scmp.lt.s32.totalorder %s292_s14, %s292_s14 }
   0xa   :  { %345 = vmatmul.mubr.msk.f32.vlgmr.msra.gmra.mxu1 %vm34_vm0, %v22_v8  ;;  %331 = vmatprep.subr.mxu0 %v23_v9  ;;  %p356_p0 = scmp.ne.s32.totalorder %s292_s14, %s355_s15  ;;  %p361_p2 = scmp.lt.s32.totalorder %s355_s15, %s355_s15 }
   0xb   :  { %332 = vmatpush3.msra.mxu0 %v23_v9  ;;  %333 = vmatprep.mubr.msk.f32.mxu0 %vm34_vm0, %v21_v2 }
   0xc   :  { %334 = vmatmul.mubr.msk.f32.vlgmr.msra.gmra.mxu0 %vm34_vm0, %v22_v8  ;;  %347 = vmatprep.subr.msk.mxu0 %vm203_vm1, %v195_v10  ;;  %p362_p3 = por %p361_p2, %p360_p1 }
   0xd   :  { %348 = vmatpush3.msk.msra.mxu0 %vm203_vm1, %v195_v10 }
   0xe   :  { %p363_p4 = pnand %p362_p3, %p356_p0 }
  0xca   :  { %v346_v11 = vpop.f32.mrf.mxu1 }
  0xcc   :  { %v186_v12 = vpop.f32.mrf.mxu1  ;;  %v335_v13 = vpop.f32.mrf.mxu0 }
  0xcd   :  { %349 = vmatprep.mubr.msk.f32.mxu0 %vm196_vm2, %v186_v12  ;;  %v113_v16 = vadd.f32 %v335_v13, %v302_v14 }
  0xce   :  { %350 = vmatmul.mubr.msk.f32.vlgmr.msra.gmra.mxu0 %vm196_vm2, %v346_v11  ;;  %v107_v15 = vpop.f32.mrf.mxu0 }
  0xcf   :  { %v108_v18 = vadd.f32 %v302_v14, %v107_v15 }
 0x18e   :  { %v351_v17 = vpop.f32.mrf.mxu0 }
 0x18f   :  { %v283_v19 = vadd.f32 %v351_v17, %v113_v16 }
 0x190   :  { %v273_v20 = vpop.f32.mrf.mxu0 }
 0x191   :  { %285 = vst.msk [vmem:[#allocation2 + $0x8] sm:$0xff] %vm34_vm0, %v283_v19  ;;  %v282_v21 = vadd.f32 %v273_v20, %v108_v18 }
 0x193   :  { %284 = vst.msk [vmem:[#allocation2] sm:$0xff] %vm34_vm0, %v282_v21 }
 0x194   :  { %366 = shalt.err (!%p363_p4)
}
 0x195   :  { %s378_s2 = smov 128   ;;  %s379_s16 = smov 8  }
 0x196   :  { %297 = dma.vmem_to_hbm [thread:$0]  %s292_s14, 256, %s460_s5, [#allocation3], %s378_s2, %s378_s2, %s379_s16  }
 0x197   :  { %375 = dma.done.wait [#allocation3], 256  }
 0x198   :  { %376 = vsyncadd [#allocation3], 4294967040 }
 0x199   :  { %301 = vsyncpa [#allocation3], 1 }

</bundles_post_ra>
